<compile_context>
chip_gen: v5e
topology: v5e:2x2
jax: 0.10.0
libtpu: 0.0.40
codegen_flags: <defaults>
</compile_context>

<pallas_src>
import numpy as np
import jax
import jax.numpy as jnp
from jax.experimental import pallas as pl
from jax.experimental.pallas import tpu as pltpu

_SUBLANE = 8


def _round_up(x, m):
    return ((x + m - 1) // m) * m


# ----------------------------------------------------------------------------
# Fused MLP kernel factory (n_layers Linear layers, ReLU between them).
# ----------------------------------------------------------------------------
def _make_mlp_kernel(n_layers):
    def kernel(x_ref, *refs):
        out_ref = refs[-1]
        wb_refs = refs[:-1]                       # (w0, b0, w1, b1, ..., wn, bn)
        h = x_ref[...]                            # (TB, d_in) f32
        for l in range(n_layers):
            w = wb_refs[2 * l][...]               # (fan_in, fan_out)
            b = wb_refs[2 * l + 1][...]           # (1, fan_out)
            h = jnp.dot(h, w,
                        preferred_element_type=jnp.float32,
                        precision=jax.lax.Precision.HIGHEST) + b
            if l < n_layers - 1:                  # hidden layers only
                h = jnp.maximum(h, 0.0)           # ReLU; dropout p=0 -> identity
        out_ref[...] = h.astype(out_ref.dtype)    # (TB, d_out) store
    return kernel


# ----------------------------------------------------------------------------
# Wrapper: batch tiling, pallas_call.
# ----------------------------------------------------------------------------
def mlp_forward(inputs, params, in_shape, out_shape, *, block_batch=2048,
                vmem_budget_bytes=40 * 1024 * 1024):
    """Run the fused MLP Pallas kernel.

    inputs : (B, *in_shape) float32
    params : list of (w, b) with w shaped (fan_in, fan_out), b shaped (1, fan_out)
    """
    in_shape = tuple(in_shape)
    out_shape = tuple(out_shape)
    if inputs.shape[1:] != in_shape:
        raise ValueError(
            f"Expected inputs of shape {in_shape}, got {inputs.shape[1:]}."
        )
    B = inputs.shape[0]
    d_in = int(np.prod(in_shape))
    d_out = int(np.prod(out_shape))
    x2d = inputs.reshape(B, d_in).astype(jnp.float32)

    # Per-layer feature widths (no padding — blocks use the full feature dim).
    dims = [d_in] + [int(w.shape[1]) for (w, _) in params]
    assert dims[-1] == d_out

    wb = []
    for (w, b) in params:
        wb += [w.astype(jnp.float32), b.astype(jnp.float32).reshape(1, -1)]

    # ---- choose batch tile (multiple of 8, fits VMEM budget) ----------------
    tb = min(_round_up(block_batch, _SUBLANE), _round_up(max(B, 1), _SUBLANE))
    # Keep >= 2 grid steps when the batch allows it, so the "parallel" axis can
    # actually be split across both TensorCores on v7x (no-op on v5e/v6e).
    if B >= 2 * _SUBLANE:
        tb = min(tb, _round_up(-(-B // 2), _SUBLANE))

    def footprint(tile):
        act = 2 * tile * (d_in + d_out) * 4                   # dbl-buffered x/out tiles
        wgt = 2 * sum(int(p.size) for p in wb) * 4            # resident (dbl-buffered) W/b
        tmp = 2 * tile * max(dims) * 4                        # live intermediates
        return act + wgt + tmp

    while tb > _SUBLANE and footprint(tb) > vmem_budget_bytes:
        tb //= 2
    tb = max(_round_up(tb, _SUBLANE), _SUBLANE)

    # Pad only the batch, only up to one tile (d_in floats per padded row).
    B_p = _round_up(max(B, 1), tb)
    x_p = jnp.pad(x2d, ((0, B_p - B), (0, 0))) if B_p > B else x2d
    grid = (B_p // tb,)

    n_layers = len(params)
    kernel = _make_mlp_kernel(n_layers)

    # x tile moves with the grid; weights/biases are resident (constant index).
    # TODO(synk): for wide hidden layers, add pipeline_mode=pl.Buffered(1) on the
    # resident weight/bias specs (or a bf16 weight path) to halve their VMEM cost.
    in_specs = [pl.BlockSpec((tb, d_in), lambda i: (i, 0))]
    in_specs += [pl.BlockSpec(p.shape, lambda i: (0, 0)) for p in wb]
    out_spec = pl.BlockSpec((tb, d_out), lambda i: (i, 0))

    flops = 2 * B_p * sum(fi * fo for fi, fo in zip(dims[:-1], dims[1:]))
    bytes_accessed = 4 * (B_p * d_in + B_p * d_out + sum(int(p.size) for p in wb))
    cost = pl.CostEstimate(flops=int(flops), transcendentals=0,
                           bytes_accessed=int(bytes_accessed))

    out2d = pl.pallas_call(
        kernel,
        out_shape=jax.ShapeDtypeStruct((B_p, d_out), jnp.float32),
        grid=grid,
        in_specs=in_specs,
        out_specs=out_spec,
        compiler_params=pltpu.CompilerParams(
            dimension_semantics=("parallel",),          # megacore on v7x
            vmem_limit_bytes=48 * 1024 * 1024,          # headroom on v7x's 64 MiB
        ),
        cost_estimate=cost,
    )(x_p, *wb)

    # strip batch padding (if any), restore out_shape
    if B_p > B:
        out2d = out2d[:B]
    return out2d.reshape((B,) + out_shape)


# ----------------------------------------------------------------------------
# Deterministic parameter init (matches nn.Linear's U(-1/sqrt(fan_in), +...))
# ----------------------------------------------------------------------------
def init_linear(key, fan_in, fan_out):
    kw, kb = jax.random.split(key)
    bound = 1.0 / np.sqrt(fan_in)
    w = jax.random.uniform(kw, (fan_in, fan_out), jnp.float32, -bound, bound)
    b = jax.random.uniform(kb, (1, fan_out), jnp.float32, -bound, bound)
    return w, b


def make_params(key, in_shape, out_shape, hidden_sizes):
    if len(hidden_sizes) == 0:
        raise ValueError("List of hidden sizes can't be empty.")
    sizes = [int(np.prod(in_shape))] + list(hidden_sizes) + [int(np.prod(out_shape))]
    keys = jax.random.split(key, len(sizes) - 1)
    return [init_linear(k, fi, fo)
            for k, fi, fo in zip(keys, sizes[:-1], sizes[1:])]


# ----------------------------------------------------------------------------
# Pure-JAX reference (same math as the PyTorch module in eval mode)
# ----------------------------------------------------------------------------
def mlp_reference(inputs, params, in_shape, out_shape):
    B = inputs.shape[0]
    h = inputs.reshape(B, int(np.prod(in_shape)))
    n = len(params)
    for l, (w, b) in enumerate(params):
        h = h @ w + b
        if l < n - 1:
            h = jnp.maximum(h, 0.0)
    return h.reshape((B,) + tuple(out_shape))


if __name__ == "__main__":
    in_shape = (4,)
    out_shape = (2,)
    hidden_sizes = [32, 32]

    key = jax.random.PRNGKey(0)
    kx, kp = jax.random.split(key)
    params = make_params(kp, in_shape, out_shape, hidden_sizes)

    # Case 1: small batch, single grid step, no batch padding.
    x = jax.random.normal(kx, (8,) + in_shape, jnp.float32)
    out = jax.block_until_ready(mlp_forward(x, params, in_shape, out_shape))
    ref = mlp_reference(x, params, in_shape, out_shape)
    np.testing.assert_allclose(np.asarray(out), np.asarray(ref),
                               rtol=1e-5, atol=1e-5)

    # Case 2: larger batch with a small tile -> multiple pipelined grid steps
    # plus partial-tile batch padding, exercising the tiled/pipelined path.
    x2 = jax.random.normal(kx, (40,) + in_shape, jnp.float32)
    out2 = jax.block_until_ready(
        mlp_forward(x2, params, in_shape, out_shape, block_batch=16))
    ref2 = mlp_reference(x2, params, in_shape, out_shape)
    np.testing.assert_allclose(np.asarray(out2), np.asarray(ref2),
                               rtol=1e-5, atol=1e-5)

    print("KERNEL_OK")
</pallas_src>

<mosaic_0001>
module attributes {stable_mosaic.version = 11 : i64} {
  func.func @kernel(%arg0: i32, %arg1: memref<8x4xf32, #tpu.memory_space<vmem>>, %arg2: memref<4x32xf32, #tpu.memory_space<vmem>>, %arg3: memref<1x32xf32, #tpu.memory_space<vmem>>, %arg4: memref<32x32xf32, #tpu.memory_space<vmem>>, %arg5: memref<1x32xf32, #tpu.memory_space<vmem>>, %arg6: memref<32x2xf32, #tpu.memory_space<vmem>>, %arg7: memref<1x2xf32, #tpu.memory_space<vmem>>, %arg8: memref<8x2xf32, #tpu.memory_space<vmem>>) attributes {dimension_semantics = [#tpu.dimension_semantics<parallel>], iteration_bounds = array<i64: 1>, scalar_prefetch = 0 : i64, scratch_operands = 0 : i64, tpu.core_type = #tpu.core_type<tc>, window_params = [{transform_indices = @transform_0, window_bounds = array<i64: 8, 4>}, {pipeline_mode = #tpu.pipeline_mode<synchronous>, transform_indices = @transform_1, window_bounds = array<i64: 4, 32>}, {pipeline_mode = #tpu.pipeline_mode<synchronous>, transform_indices = @transform_2, window_bounds = array<i64: 1, 32>}, {pipeline_mode = #tpu.pipeline_mode<synchronous>, transform_indices = @transform_3, window_bounds = array<i64: 32, 32>}, {pipeline_mode = #tpu.pipeline_mode<synchronous>, transform_indices = @transform_4, window_bounds = array<i64: 1, 32>}, {pipeline_mode = #tpu.pipeline_mode<synchronous>, transform_indices = @transform_5, window_bounds = array<i64: 32, 2>}, {pipeline_mode = #tpu.pipeline_mode<synchronous>, transform_indices = @transform_6, window_bounds = array<i64: 1, 2>}, {transform_indices = @transform_7, window_bounds = array<i64: 8, 2>}]} {
    %c0 = arith.constant 0 : index
    %c0_0 = arith.constant 0 : index
    %0 = vector.load %arg1[%c0, %c0_0] : memref<8x4xf32, #tpu.memory_space<vmem>>, vector<8x4xf32>
    %c0_1 = arith.constant 0 : index
    %c0_2 = arith.constant 0 : index
    %1 = vector.load %arg2[%c0_1, %c0_2] : memref<4x32xf32, #tpu.memory_space<vmem>>, vector<4x32xf32>
    %c0_3 = arith.constant 0 : index
    %c0_4 = arith.constant 0 : index
    %2 = vector.load %arg3[%c0_3, %c0_4] : memref<1x32xf32, #tpu.memory_space<vmem>>, vector<1x32xf32>
    %cst = arith.constant dense<0.000000e+00> : vector<8x32xf32>
    %3 = tpu.matmul %0, %1, %cst {dimension_numbers = #tpu.dot_dimension_numbers<[1], [0], [0], [1], [0, 0, 1, 1], [], []>, precision = #tpu.contract_precision<fp32>} : vector<8x4xf32>, vector<4x32xf32>, vector<8x32xf32> -> vector<8x32xf32>
    %4 = vector.broadcast %2 : vector<1x32xf32> to vector<8x32xf32>
    %5 = arith.addf %3, %4 : vector<8x32xf32>
    %cst_5 = arith.constant 0.000000e+00 : f32
    %6 = vector.broadcast %cst_5 : f32 to vector<8x32xf32>
    %7 = arith.maximumf %5, %6 : vector<8x32xf32>
    %c0_6 = arith.constant 0 : index
    %c0_7 = arith.constant 0 : index
    %8 = vector.load %arg4[%c0_6, %c0_7] : memref<32x32xf32, #tpu.memory_space<vmem>>, vector<32x32xf32>
    %c0_8 = arith.constant 0 : index
    %c0_9 = arith.constant 0 : index
    %9 = vector.load %arg5[%c0_8, %c0_9] : memref<1x32xf32, #tpu.memory_space<vmem>>, vector<1x32xf32>
    %cst_10 = arith.constant dense<0.000000e+00> : vector<8x32xf32>
    %10 = tpu.matmul %7, %8, %cst_10 {dimension_numbers = #tpu.dot_dimension_numbers<[1], [0], [0], [1], [0, 0, 1, 1], [], []>, precision = #tpu.contract_precision<fp32>} : vector<8x32xf32>, vector<32x32xf32>, vector<8x32xf32> -> vector<8x32xf32>
    %11 = vector.broadcast %9 : vector<1x32xf32> to vector<8x32xf32>
    %12 = arith.addf %10, %11 : vector<8x32xf32>
    %cst_11 = arith.constant 0.000000e+00 : f32
    %13 = vector.broadcast %cst_11 : f32 to vector<8x32xf32>
    %14 = arith.maximumf %12, %13 : vector<8x32xf32>
    %c0_12 = arith.constant 0 : index
    %c0_13 = arith.constant 0 : index
    %15 = vector.load %arg6[%c0_12, %c0_13] : memref<32x2xf32, #tpu.memory_space<vmem>>, vector<32x2xf32>
    %c0_14 = arith.constant 0 : index
    %c0_15 = arith.constant 0 : index
    %16 = vector.load %arg7[%c0_14, %c0_15] : memref<1x2xf32, #tpu.memory_space<vmem>>, vector<1x2xf32>
    %cst_16 = arith.constant dense<0.000000e+00> : vector<8x2xf32>
    %17 = tpu.matmul %14, %15, %cst_16 {dimension_numbers = #tpu.dot_dimension_numbers<[1], [0], [0], [1], [0, 0, 1, 1], [], []>, precision = #tpu.contract_precision<fp32>} : vector<8x32xf32>, vector<32x2xf32>, vector<8x2xf32> -> vector<8x2xf32>
    %18 = vector.broadcast %16 : vector<1x2xf32> to vector<8x2xf32>
    %19 = arith.addf %17, %18 : vector<8x2xf32>
    %c0_17 = arith.constant 0 : index
    %c0_18 = arith.constant 0 : index
    %20 = vector.load %arg8[%c0_17, %c0_18] : memref<8x2xf32, #tpu.memory_space<vmem>>, vector<8x2xf32>
    tpu.vector_store %arg8[%c0_17, %c0_18], %19 {strides = array<i32>} : memref<8x2xf32, #tpu.memory_space<vmem>>, vector<8x2xf32>,
    return
  }
  func.func @transform_0(%arg0: i32) -> (i32, i32) {
    %c0_i32 = arith.constant 0 : i32
    %c0_i32_0 = arith.constant 0 : i32
    return %arg0, %c0_i32 : i32, i32
  }
  func.func @transform_1(%arg0: i32) -> (i32, i32) {
    %c0_i32 = arith.constant 0 : i32
    %c0_i32_0 = arith.constant 0 : i32
    %c0_i32_1 = arith.constant 0 : i32
    return %c0_i32, %c0_i32_0 : i32, i32
  }
  func.func @transform_2(%arg0: i32) -> (i32, i32) {
    %c0_i32 = arith.constant 0 : i32
    %c0_i32_0 = arith.constant 0 : i32
    %c0_i32_1 = arith.constant 0 : i32
    return %c0_i32, %c0_i32_0 : i32, i32
  }
  func.func @transform_3(%arg0: i32) -> (i32, i32) {
    %c0_i32 = arith.constant 0 : i32
    %c0_i32_0 = arith.constant 0 : i32
    %c0_i32_1 = arith.constant 0 : i32
    return %c0_i32, %c0_i32_0 : i32, i32
  }
  func.func @transform_4(%arg0: i32) -> (i32, i32) {
    %c0_i32 = arith.constant 0 : i32
    %c0_i32_0 = arith.constant 0 : i32
    %c0_i32_1 = arith.constant 0 : i32
    return %c0_i32, %c0_i32_0 : i32, i32
  }
  func.func @transform_5(%arg0: i32) -> (i32, i32) {
    %c0_i32 = arith.constant 0 : i32
    %c0_i32_0 = arith.constant 0 : i32
    %c0_i32_1 = arith.constant 0 : i32
    return %c0_i32, %c0_i32_0 : i32, i32
  }
  func.func @transform_6(%arg0: i32) -> (i32, i32) {
    %c0_i32 = arith.constant 0 : i32
    %c0_i32_0 = arith.constant 0 : i32
    %c0_i32_1 = arith.constant 0 : i32
    return %c0_i32, %c0_i32_0 : i32, i32
  }
  func.func @transform_7(%arg0: i32) -> (i32, i32) {
    %c0_i32 = arith.constant 0 : i32
    %c0_i32_0 = arith.constant 0 : i32
    return %arg0, %c0_i32 : i32, i32
  }
}

</mosaic_0001>

<bundles_post_ra>
// kernel: tpu_custom_call.1
= control target key start
LH: loop header
LB: loop body
LE: loop exit
PB: predicated region body
PF: predicated region fallthrough
CT: control target
= control target key end

     0   :  { %vm36_vm0 = vcmask 1043456   ;;  %vm32_vm1 = vcmask 31744   ;;  %vm195_vm2 = vcmask 261120   ;;  %vm581_vm3 = vcmask 15360   ;;  %s674_s1 = inlined_call_operand.vmem [shape: f32[4,32], index: 1, kind: input, shape index: {}]   ;;  %s675_s0 = inlined_call_operand.vmem [shape: f32[8,4], index: 0, kind: input, shape index: {}]   ;;  %s676_s2 = inlined_call_operand.vmem [shape: f32[1,32], index: 2, kind: input, shape index: {}]   ;;  %s677_s3 = inlined_call_operand.vmem [shape: f32[32,32], index: 3, kind: input, shape index: {}]   ;;  %s678_s4 = inlined_call_operand.vmem [shape: f32[1,32], index: 4, kind: input, shape index: {}]   ;;  %s679_s5 = inlined_call_operand.vmem [shape: f32[32,2], index: 5, kind: input, shape index: {}]   ;;  %s680_s6 = inlined_call_operand.vmem [shape: f32[1,2], index: 6, kind: input, shape index: {}]   ;;  %s681_s7 = inlined_call_operand.vmem [shape: f32[8,2], index: 7, kind: output, shape index: {}]  }
   0x1   :  { %v27_v0 = vld [vmem:[%s674_s1] sm:$0xf]  ;;  %v190_v14 = vld [vmem:[%s677_s3 + $0x18] sm:$0xff]  ;;  %v189_v16 = vld [vmem:[%s677_s3 + $0x10] sm:$0xff] }
   0x2   :  { %v26_v1 = vld [vmem:[%s675_s0] sm:$0xff]  ;;  %v38_v2 = vsel %vm36_vm0, %v27_v0, 0  ;;  %v211_v15 = vand.u32 4294901760, %v190_v14  ;;  %v213_v18 = vand.u32 4294901760, %v189_v16  ;;  %v188_v19 = vld [vmem:[%s677_s3 + $0x8] sm:$0xff]  ;;  %v388_v58 = vld [vmem:[%s679_s5 + $0x18] sm:$0xff] }
   0x3   :  { %v34_v3 = vsel %vm32_vm1, %v26_v1, 0  ;;  %v55_v4 = vand.u32 4294901760, %v38_v2  ;;  %v215_v22 = vand.u32 4294901760, %v188_v19  ;;  %v187_v23 = vld [vmem:[%s677_s3] sm:$0xff]  ;;  %v408_v59 = vand.u32 4294901760, %v388_v58  ;;  %v387_v60 = vld [vmem:[%s679_s5 + $0x10] sm:$0xff] }
   0x4   :  { %v57_v5 = vand.u32 4294901760, %v34_v3  ;;  %v241_v17 = vsub.f32 %v190_v14, %v211_v15  ;;  %v247_v21 = vsub.f32 %v189_v16, %v213_v18  ;;  %v217_v27 = vand.u32 4294901760, %v187_v23  ;;  %v587_v38 = vld [vmem:[%s676_s2] ss:$0 sm:$0xff]  ;;  %v386_v63 = vld [vmem:[%s679_s5 + $0x8] sm:$0xff] }
   0x5   :  { %v82_v6 = vsub.f32 %v38_v2, %v55_v4  ;;  %56 = vmatpush.msra.mxu0 %v55_v4  ;;  %132 = vmatpush.msra.mxu3 %v55_v4  ;;  %v253_v26 = vsub.f32 %v188_v19, %v215_v22  ;;  %v438_v61 = vsub.f32 %v388_v58, %v408_v59  ;;  %v410_v62 = vand.u32 4294901760, %v387_v60 }
   0x6   :  { %v58_v7 = vsub.f32 %v34_v3, %v57_v5  ;;  %v242_v20 = vand.u32 4294901760, %v241_v17  ;;  %v248_v25 = vand.u32 4294901760, %v247_v21  ;;  %v259_v31 = vsub.f32 %v187_v23, %v217_v27  ;;  %v385_v3 = vld [vmem:[%s679_s5] sm:$0xff] }
   0x7   :  { %109 = vmatpush.msra.mxu2 %v82_v6  ;;  %v83_v9 = vand.u32 4294901760, %v82_v6  ;;  %v254_v30 = vand.u32 4294901760, %v253_v26  ;;  %v439_v0 = vand.u32 4294901760, %v438_v61  ;;  %v444_v1 = vsub.f32 %v387_v60, %v410_v62 }
   0x8   :  { %v59_v8 = vand.u32 4294901760, %v58_v7  ;;  %112 = vmatmul.f32.vlgmr.msra.gmra.mxu2 %v58_v7  ;;  %v243_v24 = vsub.f32 %v241_v17, %v242_v20  ;;  %v249_v29 = vsub.f32 %v247_v21, %v248_v25  ;;  %v260_v34 = vand.u32 4294901760, %v259_v31 }
   0x9   :  { %158 = vmatpush.msrb.mxu0 %v83_v9  ;;  %v84_v11 = vsub.f32 %v82_v6, %v83_v9  ;;  %212 = vmatpush.msrb.mxu2 %v211_v15  ;;  %v255_v33 = vsub.f32 %v253_v26, %v254_v30  ;;  %v412_v2 = vand.u32 4294901760, %v386_v63 }
   0xa   :  { %v60_v10 = vsub.f32 %v58_v7, %v59_v8  ;;  %136 = vmatmul.f32.vlgmr.msra.gmra.mxu3 %v59_v8  ;;  %v244_v28 = vand.u32 4294901760, %v243_v24  ;;  %v250_v32 = vand.u32 4294901760, %v249_v29  ;;  %v261_v36 = vsub.f32 %v259_v31, %v260_v34 }
   0xb   :  { %v85_v13 = vand.u32 4294901760, %v84_v11  ;;  %214 = vmatpush.msrb.mxu2 %v213_v18  ;;  %v256_v35 = vand.u32 4294901760, %v255_v33  ;;  %v450_v6 = vsub.f32 %v386_v63, %v412_v2  ;;  %v414_v7 = vand.u32 4294901760, %v385_v3 }
   0xc   :  { %v61_v12 = vand.u32 4294901760, %v60_v10  ;;  %245 = vmatpush.msrb.mxu3 %v244_v28  ;;  %v262_v37 = vand.u32 4294901760, %v261_v36 }
   0xd   :  { %86 = vmatpush.msra.mxu1 %v85_v13  ;;  %216 = vmatpush.msrb.mxu2 %v215_v22  ;;  %v451_v10 = vand.u32 4294901760, %v450_v6  ;;  %v456_v11 = vsub.f32 %v385_v3, %v414_v7 }
   0xe   :  { %62 = vmatmul.f32.vlgmr.msra.gmra.mxu0 %v61_v12  ;;  %88 = vmatmul.f32.vlgmr.msra.gmra.mxu1 %v57_v5 }
   0xf   :  { %180 = vmatpush.msrb.mxu1 %v55_v4  ;;  %283 = vmatpush.msra.mxu0 %v241_v17  ;;  %v440_v4 = vsub.f32 %v438_v61, %v439_v0  ;;  %v452_v13 = vsub.f32 %v450_v6, %v451_v10  ;;  %v457_v14 = vand.u32 4294901760, %v456_v11 }
  0x10   :  { %218 = vmatpush.msrb.mxu2 %v217_v27  ;;  %251 = vmatpush.msrb.mxu3 %v250_v32 }
  0x11   :  { %312 = vmatpush.msra.mxu1 %v211_v15  ;;  %286 = vmatpush.msra.mxu0 %v247_v21  ;;  %v441_v8 = vand.u32 4294901760, %v440_v4  ;;  %v458_v16 = vsub.f32 %v456_v11, %v457_v14 }
  0x12   :  { %341 = vmatpush.msra.mxu2 %v242_v20  ;;  %257 = vmatpush.msrb.mxu3 %v256_v35 }
  0x13   :  { %314 = vmatpush.msra.mxu1 %v213_v18  ;;  %289 = vmatpush.msra.mxu0 %v253_v26  ;;  %v459_v17 = vand.u32 4294901760, %v458_v16 }
  0x14   :  { %345 = vmatpush.msra.mxu2 %v248_v25  ;;  %263 = vmatpush.msrb.mxu3 %v262_v37 }
  0x15   :  { %316 = vmatpush.msra.mxu1 %v215_v22  ;;  %292 = vmatpush.msra.mxu0 %v259_v31 }
  0x16   :  { %160 = vmatmul.f32.vlgmr.msrb.gmra.mxu0 %v57_v5  ;;  %182 = vmatmul.f32.vlgmr.msrb.gmra.mxu1 %v57_v5  ;;  %v445_v5 = vand.u32 4294901760, %v444_v1 }
  0x17   :  { %318 = vmatpush.msra.mxu1 %v217_v27  ;;  %349 = vmatpush.msra.mxu2 %v254_v30 }
  0x18   :  { %372 = vmatpush.msra.mxu3 %v211_v15  ;;  %409 = vmatpush.msrb.mxu0 %v408_v59  ;;  %v446_v9 = vsub.f32 %v444_v1, %v445_v5  ;;  %v453_v15 = vand.u32 4294901760, %v452_v13 }
  0x19   :  { %353 = vmatpush.msra.mxu2 %v260_v34  ;;  %442 = vmatpush.msrb.mxu1 %v441_v8 }
  0x1a   :  { %374 = vmatpush.msra.mxu3 %v213_v18  ;;  %411 = vmatpush.msrb.mxu0 %v410_v62  ;;  %v447_v12 = vand.u32 4294901760, %v446_v9  ;;  %v588_v18 = vld [vmem:[%s678_s4] ss:$0 sm:$0xff] }
  0x1c   :  { %376 = vmatpush.msra.mxu3 %v215_v22  ;;  %413 = vmatpush.msrb.mxu0 %v412_v2 }
  0x1d   :  { %448 = vmatpush.msrb.mxu1 %v447_v12 }
  0x1e   :  { %378 = vmatpush.msra.mxu3 %v217_v27  ;;  %415 = vmatpush.msrb.mxu0 %v414_v7 }
  0x1f   :  { %454 = vmatpush.msrb.mxu1 %v453_v15 }
  0x21   :  { %460 = vmatpush.msrb.mxu1 %v459_v17 }
  0x8b   :  { %v63_v39 = vpop.f32.mrf.mxu0  ;;  %v89_v41 = vpop.f32.mrf.mxu1 }
  0x8c   :  { %v64_v40 = vadd.f32 %v587_v38, %v63_v39  ;;  %v113_v42 = vpop.f32.mrf.mxu2  ;;  %v589_v38 = vld [vmem:[%s680_s6] ss:$0 sm:$0xff] }
  0x8d   :  { %v137_v44 = vpop.f32.mrf.mxu3 }
  0x8e   :  { %v90_v43 = vadd.f32 %v89_v41, %v64_v40 }
  0x90   :  { %v114_v45 = vadd.f32 %v113_v42, %v90_v43 }
  0x92   :  { %v138_v46 = vadd.f32 %v137_v44, %v114_v45 }
  0x93   :  { %v161_v47 = vpop.f32.mrf.mxu0  ;;  %v183_v49 = vpop.f32.mrf.mxu1 }
  0x94   :  { %v162_v48 = vadd.f32 %v161_v47, %v138_v46 }
  0x96   :  { %v184_v50 = vadd.f32 %v183_v49, %v162_v48 }
  0x98   :  { %v186_v51 = vmax.f32 %v184_v50, 0.0 }
  0x9a   :  { %v197_v52 = vsel %vm195_vm2, %v186_v51, 0 }
  0x9b   :  { %v219_v53 = vand.u32 4294901760, %v197_v52 }
  0x9d   :  { %v220_v54 = vsub.f32 %v197_v52, %v219_v53  ;;  %265 = vmatmul.f32.vlgmr.msrb.gmra.mxu3 %v219_v53 }
  0x9e   :  { %509 = vmatpush.msrb.mxu3 %v408_v59 }
  0x9f   :  { %295 = vmatmul.f32.vlgmr.msra.gmra.mxu0 %v220_v54  ;;  %v221_v55 = vand.u32 4294901760, %v220_v54 }
  0xa0   :  { %511 = vmatpush.msrb.mxu3 %v410_v62  ;;  %538 = vmatpush.msra.mxu0 %v439_v0 }
  0xa1   :  { %322 = vmatmul.f32.vlgmr.msra.gmra.mxu1 %v221_v55  ;;  %v222_v56 = vsub.f32 %v220_v54, %v221_v55 }
  0xa2   :  { %513 = vmatpush.msrb.mxu3 %v412_v2  ;;  %542 = vmatpush.msra.mxu0 %v445_v5 }
  0xa3   :  { %v223_v57 = vand.u32 4294901760, %v222_v56  ;;  %569 = vmatpush.msra.mxu1 %v408_v59 }
  0xa4   :  { %515 = vmatpush.msrb.mxu3 %v414_v7  ;;  %546 = vmatpush.msra.mxu0 %v451_v10 }
  0xa5   :  { %224 = vmatmul.f32.vlgmr.msrb.gmra.mxu2 %v223_v57  ;;  %380 = vmatmul.f32.vlgmr.msra.gmra.mxu3 %v219_v53 }
  0xa6   :  { %480 = vmatpush.msrb.mxu2 %v438_v61  ;;  %550 = vmatpush.msra.mxu0 %v457_v14 }
  0xa7   :  { %571 = vmatpush.msra.mxu1 %v410_v62 }
  0xa8   :  { %483 = vmatpush.msrb.mxu2 %v444_v1 }
  0xa9   :  { %573 = vmatpush.msra.mxu1 %v412_v2 }
  0xaa   :  { %486 = vmatpush.msrb.mxu2 %v450_v6 }
  0xab   :  { %575 = vmatpush.msra.mxu1 %v414_v7 }
  0xac   :  { %489 = vmatpush.msrb.mxu2 %v456_v11 }
  0xad   :  { %355 = vmatmul.f32.vlgmr.msra.gmra.mxu2 %v219_v53 }
 0x11c   :  { %v296_v23 = vpop.f32.mrf.mxu0 }
 0x11e   :  { %v323_v25 = vpop.f32.mrf.mxu1 }
 0x120   :  { %v266_v19 = vpop.f32.mrf.mxu3 }
 0x128   :  { %v225_v20 = vpop.f32.mrf.mxu2  ;;  %v381_v29 = vpop.f32.mrf.mxu3 }
 0x129   :  { %v226_v21 = vadd.f32 %v588_v18, %v225_v20 }
 0x12b   :  { %v267_v22 = vadd.f32 %v266_v19, %v226_v21 }
 0x12d   :  { %v297_v24 = vadd.f32 %v296_v23, %v267_v22 }
 0x12f   :  { %v324_v26 = vadd.f32 %v323_v25, %v297_v24 }
 0x130   :  { %v356_v27 = vpop.f32.mrf.mxu2 }
 0x131   :  { %v357_v28 = vadd.f32 %v356_v27, %v324_v26 }
 0x133   :  { %v382_v30 = vadd.f32 %v381_v29, %v357_v28 }
 0x135   :  { %v384_v31 = vmax.f32 %v382_v30, 0.0 }
 0x137   :  { %v394_v32 = vsel %vm195_vm2, %v384_v31, 0 }
 0x138   :  { %v416_v33 = vand.u32 4294901760, %v394_v32 }
 0x13a   :  { %v417_v34 = vsub.f32 %v394_v32, %v416_v33  ;;  %462 = vmatmul.f32.vlgmr.msrb.gmra.mxu1 %v416_v33 }
 0x13c   :  { %492 = vmatmul.f32.vlgmr.msrb.gmra.mxu2 %v417_v34  ;;  %v418_v35 = vand.u32 4294901760, %v417_v34 }
 0x13e   :  { %519 = vmatmul.f32.vlgmr.msrb.gmra.mxu3 %v418_v35  ;;  %v419_v36 = vsub.f32 %v417_v34, %v418_v35 }
 0x140   :  { %v420_v37 = vand.u32 4294901760, %v419_v36 }
 0x142   :  { %421 = vmatmul.f32.vlgmr.msrb.gmra.mxu0 %v420_v37  ;;  %577 = vmatmul.f32.vlgmr.msra.gmra.mxu1 %v416_v33 }
 0x14a   :  { %552 = vmatmul.f32.vlgmr.msra.gmra.mxu0 %v416_v33 }
 0x1b7   :  { %v463_v39 = vpop.f32.mrf.mxu1 }
 0x1bf   :  { %v422_v40 = vpop.f32.mrf.mxu0  ;;  %v493_v43 = vpop.f32.mrf.mxu2 }
 0x1c0   :  { %v423_v41 = vadd.f32 %v589_v38, %v422_v40  ;;  %v578_v49 = vpop.f32.mrf.mxu1 }
 0x1c1   :  { %v520_v45 = vpop.f32.mrf.mxu3 }
 0x1c2   :  { %v464_v42 = vadd.f32 %v463_v39, %v423_v41 }
 0x1c4   :  { %v494_v44 = vadd.f32 %v493_v43, %v464_v42 }
 0x1c6   :  { %v521_v46 = vadd.f32 %v520_v45, %v494_v44 }
 0x1c7   :  { %v553_v47 = vpop.f32.mrf.mxu0 }
 0x1c8   :  { %v554_v48 = vadd.f32 %v553_v47, %v521_v46 }
 0x1ca   :  { %v579_v50 = vadd.f32 %v578_v49, %v554_v48 }
 0x1cc   :  { %582 = vst.msk [vmem:[%s681_s7] sm:$0xff] %vm581_vm3, %v579_v50 }

</bundles_post_ra>
